<compile_context>
chip_gen: v6e
topology: v6e:2x2x1
jax: 0.10.0
libtpu: 0.0.40
codegen_flags: <defaults>
</compile_context>

<pallas_src>
import functools

import jax
import jax.numpy as jnp
from jax.experimental import pallas as pl
from jax.experimental.pallas import tpu as pltpu


def _round_up(x, m):
    return (x + m - 1) // m * m


def _ffn_kernel(x_ref, w1_ref, b1_ref, w2_ref, b2_ref, o_ref):
    # x_ref: (tile_m, d_in_p) tile of tokens; weights are full (untiled) blocks
    # that stay resident in VMEM across the grid (constant index maps).
    x = x_ref[...]                                     # native dtype -> MXU
    h = jnp.dot(x, w1_ref[...], preferred_element_type=jnp.float32)
    h = jnp.maximum(h + b1_ref[...].astype(jnp.float32), 0.0)      # bias + ReLU (f32)
    y = jnp.dot(h.astype(w2_ref.dtype), w2_ref[...],
                preferred_element_type=jnp.float32)
    y = y + b2_ref[...].astype(jnp.float32) + x.astype(jnp.float32)  # residual in f32
    # TODO(synk): dropout(p=0.3) is identity here (eval mode); training would
    # need pltpu.prng_seed / pltpu.prng_random_bits + rescaling.
    o_ref[...] = y.astype(o_ref.dtype)


def positionwise_ffn(x, w1, b1, w2, b2, *, tile_m=256):
    """x: (B, L, d_in). w1: (d_in, d_hid), b1: (1, d_hid),
    w2: (d_hid, d_in), b2: (1, d_in). Returns (B, L, d_in)."""
    B, L, d_in = x.shape
    d_hid = w1.shape[1]
    M = B * L

    # Pad feature dims to lane-dense multiples of 128 and tokens to the tile.
    d_in_p = _round_up(d_in, 128)
    d_hid_p = _round_up(d_hid, 128)
    tile_m = min(tile_m, _round_up(M, 8))        # keep tile a multiple of 8 sublanes
    M_p = _round_up(M, tile_m)

    x2d = jnp.pad(x.reshape(M, d_in), ((0, M_p - M), (0, d_in_p - d_in)))
    w1p = jnp.pad(w1, ((0, d_in_p - d_in), (0, d_hid_p - d_hid)))
    b1p = jnp.pad(b1, ((0, 0), (0, d_hid_p - d_hid)))
    w2p = jnp.pad(w2, ((0, d_hid_p - d_hid), (0, d_in_p - d_in)))
    b2p = jnp.pad(b2, ((0, 0), (0, d_in_p - d_in)))

    grid = (M_p // tile_m,)

    # Advisory cost estimate: 2 matmuls -> 4*M*K*N flops; bytes = acts + weights.
    itemsize = x2d.dtype.itemsize
    w_itemsize = w1p.dtype.itemsize
    cost = pl.CostEstimate(
        flops=4 * M_p * d_in_p * d_hid_p,
        transcendentals=0,
        bytes_accessed=(2 * M_p * d_in_p * itemsize
                        + (w1p.size + w2p.size + b1p.size + b2p.size) * w_itemsize),
    )

    out2d = pl.pallas_call(
        _ffn_kernel,
        out_shape=jax.ShapeDtypeStruct((M_p, d_in_p), x.dtype),
        grid_spec=pltpu.PrefetchScalarGridSpec(
            num_scalar_prefetch=0,
            grid=grid,
            in_specs=[
                pl.BlockSpec((tile_m, d_in_p), lambda i: (i, 0)),     # x tile
                pl.BlockSpec((d_in_p, d_hid_p), lambda i: (0, 0)),    # W1 (resident)
                pl.BlockSpec((1, d_hid_p), lambda i: (0, 0)),         # b1
                pl.BlockSpec((d_hid_p, d_in_p), lambda i: (0, 0)),    # W2 (resident)
                pl.BlockSpec((1, d_in_p), lambda i: (0, 0)),          # b2
            ],
            out_specs=pl.BlockSpec((tile_m, d_in_p), lambda i: (i, 0)),
        ),
        compiler_params=pltpu.CompilerParams(
            dimension_semantics=("parallel",),
            vmem_limit_bytes=64 * 1024 * 1024,   # room for large tiles; <= v7x physical
        ),
        cost_estimate=cost,
    )(x2d, w1p, b1p, w2p, b2p)

    return out2d[:M, :d_in].reshape(B, L, d_in)


def _kaiming_uniform(key, fan, shape, dtype=jnp.float32):
    # gain for relu = sqrt(2); bound = gain * sqrt(3 / fan)
    bound = jnp.sqrt(2.0) * jnp.sqrt(3.0 / fan)
    return jax.random.uniform(key, shape, dtype, minval=-bound, maxval=bound)


def make_params(key, d_in, d_hid):
    k1, k2, k3, k4 = jax.random.split(key, 4)
    # PyTorch conv weight shapes: w_1.weight (d_hid, d_in, 1) -> kaiming fan_out = d_hid
    #                             w_2.weight (d_in, d_hid, 1) -> kaiming fan_in  = d_hid
    w1_torch = _kaiming_uniform(k1, d_hid, (d_hid, d_in))   # (out, in)
    w2_torch = _kaiming_uniform(k2, d_hid, (d_in, d_hid))   # (out, in)
    # Conv1d default bias init: U(-1/sqrt(fan_in), 1/sqrt(fan_in))
    b1 = jax.random.uniform(k3, (1, d_hid), jnp.float32,
                            minval=-1.0 / jnp.sqrt(d_in), maxval=1.0 / jnp.sqrt(d_in))
    b2 = jax.random.uniform(k4, (1, d_in), jnp.float32,
                            minval=-1.0 / jnp.sqrt(d_hid), maxval=1.0 / jnp.sqrt(d_hid))
    # Transpose to (in, out) for x @ W layout.
    return w1_torch.T, b1, w2_torch.T, b2


def reference(x, w1, b1, w2, b2):
    h = jnp.maximum(jnp.einsum("bld,dh->blh", x, w1) + b1[0], 0.0)
    y = jnp.einsum("blh,hd->bld", h, w2) + b2[0]
    return y + x


if __name__ == "__main__":
    B, L, d_in, d_hid = 2, 8, 32, 64

    key = jax.random.PRNGKey(0)
    kx, kp = jax.random.split(key)
    x = jax.random.normal(kx, (B, L, d_in), jnp.float32)
    w1, b1, w2, b2 = make_params(kp, d_in, d_hid)

    out = positionwise_ffn(x, w1, b1, w2, b2)
    out = jax.block_until_ready(out)

    ref = reference(x, w1, b1, w2, b2)
    assert out.shape == (B, L, d_in)
    assert jnp.allclose(out, ref, atol=1e-5, rtol=1e-5), "mismatch vs reference"

    print("KERNEL_OK")
</pallas_src>

<mosaic_0001>
module attributes {stable_mosaic.version = 11 : i64} {
  func.func @_ffn_kernel(%arg0: i32, %arg1: memref<16x128xf32, #tpu.memory_space<vmem>>, %arg2: memref<128x128xf32, #tpu.memory_space<vmem>>, %arg3: memref<1x128xf32, #tpu.memory_space<vmem>>, %arg4: memref<128x128xf32, #tpu.memory_space<vmem>>, %arg5: memref<1x128xf32, #tpu.memory_space<vmem>>, %arg6: memref<16x128xf32, #tpu.memory_space<vmem>>) attributes {dimension_semantics = [#tpu.dimension_semantics<parallel>], iteration_bounds = array<i64: 1>, scalar_prefetch = 0 : i64, scratch_operands = 0 : i64, tpu.core_type = #tpu.core_type<tc>, window_params = [{transform_indices = @transform_0, window_bounds = array<i64: 16, 128>}, {pipeline_mode = #tpu.pipeline_mode<synchronous>, transform_indices = @transform_1, window_bounds = array<i64: 128, 128>}, {pipeline_mode = #tpu.pipeline_mode<synchronous>, transform_indices = @transform_2, window_bounds = array<i64: 1, 128>}, {pipeline_mode = #tpu.pipeline_mode<synchronous>, transform_indices = @transform_3, window_bounds = array<i64: 128, 128>}, {pipeline_mode = #tpu.pipeline_mode<synchronous>, transform_indices = @transform_4, window_bounds = array<i64: 1, 128>}, {transform_indices = @transform_5, window_bounds = array<i64: 16, 128>}]} {
    %c0 = arith.constant 0 : index
    %c0_0 = arith.constant 0 : index
    %0 = vector.load %arg1[%c0, %c0_0] : memref<16x128xf32, #tpu.memory_space<vmem>>, vector<16x128xf32>
    %c0_1 = arith.constant 0 : index
    %c0_2 = arith.constant 0 : index
    %1 = vector.load %arg2[%c0_1, %c0_2] : memref<128x128xf32, #tpu.memory_space<vmem>>, vector<128x128xf32>
    %cst = arith.constant dense<0.000000e+00> : vector<16x128xf32>
    %2 = tpu.matmul %0, %1, %cst {dimension_numbers = #tpu.dot_dimension_numbers<[1], [0], [0], [1], [0, 0, 1, 1], [], []>} : vector<16x128xf32>, vector<128x128xf32>, vector<16x128xf32> -> vector<16x128xf32>
    %c0_3 = arith.constant 0 : index
    %c0_4 = arith.constant 0 : index
    %3 = vector.load %arg3[%c0_3, %c0_4] : memref<1x128xf32, #tpu.memory_space<vmem>>, vector<1x128xf32>
    %4 = vector.broadcast %3 : vector<1x128xf32> to vector<16x128xf32>
    %5 = arith.addf %2, %4 : vector<16x128xf32>
    %cst_5 = arith.constant 0.000000e+00 : f32
    %6 = vector.broadcast %cst_5 : f32 to vector<16x128xf32>
    %7 = arith.maximumf %5, %6 : vector<16x128xf32>
    %c0_6 = arith.constant 0 : index
    %c0_7 = arith.constant 0 : index
    %8 = vector.load %arg4[%c0_6, %c0_7] : memref<128x128xf32, #tpu.memory_space<vmem>>, vector<128x128xf32>
    %cst_8 = arith.constant dense<0.000000e+00> : vector<16x128xf32>
    %9 = tpu.matmul %7, %8, %cst_8 {dimension_numbers = #tpu.dot_dimension_numbers<[1], [0], [0], [1], [0, 0, 1, 1], [], []>} : vector<16x128xf32>, vector<128x128xf32>, vector<16x128xf32> -> vector<16x128xf32>
    %c0_9 = arith.constant 0 : index
    %c0_10 = arith.constant 0 : index
    %10 = vector.load %arg5[%c0_9, %c0_10] : memref<1x128xf32, #tpu.memory_space<vmem>>, vector<1x128xf32>
    %11 = vector.broadcast %10 : vector<1x128xf32> to vector<16x128xf32>
    %12 = arith.addf %9, %11 : vector<16x128xf32>
    %13 = arith.addf %12, %0 : vector<16x128xf32>
    %c0_11 = arith.constant 0 : index
    %c0_12 = arith.constant 0 : index
    %14 = vector.load %arg6[%c0_11, %c0_12] : memref<16x128xf32, #tpu.memory_space<vmem>>, vector<16x128xf32>
    tpu.vector_store %arg6[%c0_11, %c0_12], %13 {strides = array<i32>} : memref<16x128xf32, #tpu.memory_space<vmem>>, vector<16x128xf32>,
    return
  }
  func.func @transform_0(%arg0: i32) -> (i32, i32) {
    %c0_i32 = arith.constant 0 : i32
    %c0_i32_0 = arith.constant 0 : i32
    return %arg0, %c0_i32 : i32, i32
  }
  func.func @transform_1(%arg0: i32) -> (i32, i32) {
    %c0_i32 = arith.constant 0 : i32
    %c0_i32_0 = arith.constant 0 : i32
    %c0_i32_1 = arith.constant 0 : i32
    return %c0_i32, %c0_i32_0 : i32, i32
  }
  func.func @transform_2(%arg0: i32) -> (i32, i32) {
    %c0_i32 = arith.constant 0 : i32
    %c0_i32_0 = arith.constant 0 : i32
    %c0_i32_1 = arith.constant 0 : i32
    return %c0_i32, %c0_i32_0 : i32, i32
  }
  func.func @transform_3(%arg0: i32) -> (i32, i32) {
    %c0_i32 = arith.constant 0 : i32
    %c0_i32_0 = arith.constant 0 : i32
    %c0_i32_1 = arith.constant 0 : i32
    return %c0_i32, %c0_i32_0 : i32, i32
  }
  func.func @transform_4(%arg0: i32) -> (i32, i32) {
    %c0_i32 = arith.constant 0 : i32
    %c0_i32_0 = arith.constant 0 : i32
    %c0_i32_1 = arith.constant 0 : i32
    return %c0_i32, %c0_i32_0 : i32, i32
  }
  func.func @transform_5(%arg0: i32) -> (i32, i32) {
    %c0_i32 = arith.constant 0 : i32
    %c0_i32_0 = arith.constant 0 : i32
    return %arg0, %c0_i32 : i32, i32
  }
}

</mosaic_0001>

<bundles_post_ra>
// kernel: tpu_custom_call.1
= control target key start
LH: loop header
LB: loop body
LE: loop exit
PB: predicated region body
PF: predicated region fallthrough
CT: control target
= control target key end

     0   :  { %10 = vsyncpa [#allocation3], 0  ;;  %s554_s0 = inlined_call_operand.hbm [shape: f32[16,128], index: 0, kind: input, shape index: {}]   ;;  %s555_s1 = inlined_call_operand.hbm [shape: f32[128,128], index: 1, kind: input, shape index: {}]   ;;  %s556_s2 = inlined_call_operand.vmem [shape: f32[1,128], index: 2, kind: input, shape index: {}]   ;;  %s557_s3 = inlined_call_operand.hbm [shape: f32[128,128], index: 3, kind: input, shape index: {}]   ;;  %s558_s4 = inlined_call_operand.vmem [shape: f32[1,128], index: 4, kind: input, shape index: {}]   ;;  %s559_s5 = inlined_call_operand.hbm [shape: f32[16,128], index: 5, kind: output, shape index: {}]  }
   0x1   :  { %11 = vsyncpa [#allocation6], 0 }
   0x2   :  { %12 = vsyncpa [#allocation4], 0  ;;  %s484_s18 = smov [#allocation5]   ;;  %s485_s20 = smov [#allocation2]  }
   0x3   :  { %s30_s19 = sshll.u32 %s484_s18, 4  ;;  %s18_s21 = sshll.u32 %s485_s20, 4  ;;  %s31_s19 = int_to_ptr.vmem [resolvable:$true] %s30_s19  ;;  %s19_s21 = int_to_ptr.vmem [resolvable:$true] %s18_s21 }
   0x4   :  { %s406_s22 = scalar_lea.vmem %s31_s19, 2048  ;;  %p411_p1 = scmp.lt.s32.totalorder %s31_s19, %s31_s19 }
   0x5   :  { %p407_p0 = scmp.ne.s32.totalorder %s31_s19, %s406_s22  ;;  %p412_p2 = scmp.lt.s32.totalorder %s406_s22, %s406_s22 }
   0x7   :  { %p413_p3 = por %p412_p2, %p411_p1 }
   0x9   :  { %p414_p4 = pnand %p413_p3, %p407_p0 }
   0xb   :  { %417 = shalt.err (!%p414_p4)
}
   0xc   :  { %s486_s23 = smov 128   ;;  %s487_s24 = smov 8  }
   0xd   :  { %36 = dma.hbm_to_vmem [thread:$0]  %s555_s1, 2048, %s31_s19, [#allocation6], %s486_s23, %s486_s23, %s487_s24  }
   0xe   :  { %s426_s27 = scalar_lea.vmem %s19_s21, 256  ;;  %p431_p6 = scmp.lt.s32.totalorder %s19_s21, %s19_s21 }
   0xf   :  { %p427_p5 = scmp.ne.s32.totalorder %s19_s21, %s426_s27  ;;  %p432_p7 = scmp.lt.s32.totalorder %s426_s27, %s426_s27 }
  0x11   :  { %p433_p8 = por %p432_p7, %p431_p6 }
  0x13   :  { %p434_p9 = pnand %p433_p8, %p427_p5 }
  0x15   :  { %437 = shalt.err (!%p434_p9)
}
  0x16   :  { %24 = dma.hbm_to_vmem [thread:$0]  %s554_s0, 256, %s19_s21, [#allocation3], %s486_s23, %s486_s23, %s487_s24  }
  0x17   :  { %s488_s30 = smov [#allocation7]  }
  0x18   :  { %s44_s6 = sshll.u32 %s488_s30, 4  ;;  %s45_s6 = int_to_ptr.vmem [resolvable:$true] %s44_s6 }
  0x19   :  { %s446_s7 = scalar_lea.vmem %s45_s6, 2048  ;;  %p451_p11 = scmp.lt.s32.totalorder %s45_s6, %s45_s6 }
  0x1a   :  { %p447_p10 = scmp.ne.s32.totalorder %s45_s6, %s446_s7  ;;  %p452_p12 = scmp.lt.s32.totalorder %s446_s7, %s446_s7 }
  0x1c   :  { %p453_p13 = por %p452_p12, %p451_p11 }
  0x1e   :  { %p454_p0 = pnand %p453_p13, %p447_p10 }
  0x20   :  { %457 = shalt.err (!%p454_p0)
}
  0x21   :  { %50 = dma.hbm_to_vmem [thread:$0]  %s557_s3, 2048, %s45_s6, [#allocation6], %s486_s23, %s486_s23, %s487_s24  }
  0x22   :  { %478 = dma.done.wait [#allocation3], 256  }
  0x23   :  { %479 = vsyncadd [#allocation3], 4294967040 }
  0x24   :  { %480 = dma.done.wait [#allocation6], 4096  }
  0x25   :  { %481 = vsyncadd [#allocation6], 4294963200  ;;  %v79_v0 = vld [vmem:[#allocation5 + $0x78] sm:$0xff]  ;;  %v78_v1 = vld [vmem:[#allocation5 + $0x70] sm:$0xff]  ;;  %s489_s11 = smov [#allocation8]  }
  0x26   :  { %322 = vmatprep.subr.mxu0 %v79_v0  ;;  %v77_v2 = vld [vmem:[#allocation5 + $0x68] sm:$0xff]  ;;  %v76_v3 = vld [vmem:[#allocation5 + $0x60] sm:$0xff]  ;;  %v538_v4 = vld [vmem:[#allocation2] sm:$0xff]  ;;  %s271_s12 = sshll.u32 %s489_s11, 4  ;;  %s272_s12 = int_to_ptr.vmem [resolvable:$true] %s271_s12 }
  0x27   :  { %323 = vmatpush3.msra.mxu0 %v79_v0  ;;  %v75_v5 = vld [vmem:[#allocation5 + $0x58] sm:$0xff]  ;;  %354 = vmatprep.mubr.f32.mxu0 %v538_v4  ;;  %v178_v7 = vld [vmem:[#allocation7 + $0x70] sm:$0xff]  ;;  %v177_v9 = vld [vmem:[#allocation7 + $0x68] sm:$0xff]  ;;  %p463_p2 = scmp.lt.s32.totalorder %s272_s12, %s272_s12 }
  0x28   :  { %324 = vmatprep.subr.mxu0 %v78_v1  ;;  %v179_v6 = vld [vmem:[#allocation7 + $0x78] sm:$0xff]  ;;  %v74_v8 = vld [vmem:[#allocation5 + $0x50] sm:$0xff]  ;;  %v73_v10 = vld [vmem:[#allocation5 + $0x48] sm:$0xff] }
  0x29   :  { %325 = vmatpush3.msra.mxu0 %v78_v1  ;;  %357 = vmatprep.subr.mxu1 %v179_v6  ;;  %v176_v11 = vld [vmem:[#allocation7 + $0x60] sm:$0xff]  ;;  %v175_v13 = vld [vmem:[#allocation7 + $0x58] sm:$0xff]  ;;  %v174_v15 = vld [vmem:[#allocation7 + $0x50] sm:$0xff] }
  0x2a   :  { %326 = vmatprep.subr.mxu0 %v77_v2  ;;  %358 = vmatpush3.msra.mxu1 %v179_v6  ;;  %v72_v12 = vld [vmem:[#allocation5 + $0x40] sm:$0xff]  ;;  %v71_v14 = vld [vmem:[#allocation5 + $0x38] sm:$0xff]  ;;  %v70_v16 = vld [vmem:[#allocation5 + $0x30] sm:$0xff] }
  0x2b   :  { %327 = vmatpush3.msra.mxu0 %v77_v2  ;;  %359 = vmatprep.subr.mxu1 %v178_v7  ;;  %v173_v17 = vld [vmem:[#allocation7 + $0x48] sm:$0xff]  ;;  %v172_v19 = vld [vmem:[#allocation7 + $0x40] sm:$0xff]  ;;  %v171_v21 = vld [vmem:[#allocation7 + $0x38] sm:$0xff] }
  0x2c   :  { %328 = vmatprep.subr.mxu0 %v76_v3  ;;  %360 = vmatpush3.msra.mxu1 %v178_v7  ;;  %v69_v18 = vld [vmem:[#allocation5 + $0x28] sm:$0xff]  ;;  %v68_v20 = vld [vmem:[#allocation5 + $0x20] sm:$0xff]  ;;  %v67_v22 = vld [vmem:[#allocation5 + $0x18] sm:$0xff] }
  0x2d   :  { %329 = vmatpush3.msra.mxu0 %v76_v3  ;;  %361 = vmatprep.subr.mxu1 %v177_v9  ;;  %v170_v23 = vld [vmem:[#allocation7 + $0x30] sm:$0xff]  ;;  %v169_v25 = vld [vmem:[#allocation7 + $0x28] sm:$0xff]  ;;  %v168_v27 = vld [vmem:[#allocation7 + $0x20] sm:$0xff] }
  0x2e   :  { %330 = vmatprep.subr.mxu0 %v75_v5  ;;  %362 = vmatpush3.msra.mxu1 %v177_v9  ;;  %v66_v24 = vld [vmem:[#allocation5 + $0x10] sm:$0xff]  ;;  %v65_v26 = vld [vmem:[#allocation5 + $0x8] sm:$0xff]  ;;  %v64_v28 = vld [vmem:[#allocation5] sm:$0xff] }
  0x2f   :  { %331 = vmatpush3.msra.mxu0 %v75_v5  ;;  %363 = vmatprep.subr.mxu1 %v176_v11  ;;  %v63_v29 = vld [vmem:[#allocation2 + $0x8] sm:$0xff]  ;;  %v166_v31 = vld [vmem:[#allocation7 + $0x10] sm:$0xff]  ;;  %v165_v32 = vld [vmem:[#allocation7 + $0x8] sm:$0xff] }
  0x30   :  { %332 = vmatprep.subr.mxu0 %v74_v8  ;;  %364 = vmatpush3.msra.mxu1 %v176_v11  ;;  %v167_v30 = vld [vmem:[#allocation7 + $0x18] sm:$0xff]  ;;  %v164_v33 = vld [vmem:[#allocation7] sm:$0xff]  ;;  %v284_v34 = vld [vmem:[%s556_s2] ss:$0 sm:$0xff]  ;;  %s458_s2 = scalar_lea.vmem %s272_s12, 256 }
  0x31   :  { %333 = vmatpush3.msra.mxu0 %v74_v8  ;;  %365 = vmatprep.subr.mxu1 %v175_v13  ;;  %v285_v41 = vld [vmem:[%s558_s4] ss:$0 sm:$0xff]  ;;  %p459_p1 = scmp.ne.s32.totalorder %s272_s12, %s458_s2  ;;  %p464_p3 = scmp.lt.s32.totalorder %s458_s2, %s458_s2 }
  0x32   :  { %334 = vmatprep.subr.mxu0 %v73_v10  ;;  %366 = vmatpush3.msra.mxu1 %v175_v13 }
  0x33   :  { %335 = vmatpush3.msra.mxu0 %v73_v10  ;;  %367 = vmatprep.subr.mxu1 %v174_v15  ;;  %p465_p4 = por %p464_p3, %p463_p2 }
  0x34   :  { %336 = vmatprep.subr.mxu0 %v72_v12  ;;  %368 = vmatpush3.msra.mxu1 %v174_v15 }
  0x35   :  { %337 = vmatpush3.msra.mxu0 %v72_v12  ;;  %369 = vmatprep.subr.mxu1 %v173_v17  ;;  %p466_p5 = pnand %p465_p4, %p459_p1 }
  0x36   :  { %338 = vmatprep.subr.mxu0 %v71_v14  ;;  %370 = vmatpush3.msra.mxu1 %v173_v17 }
  0x37   :  { %339 = vmatpush3.msra.mxu0 %v71_v14  ;;  %371 = vmatprep.subr.mxu1 %v172_v19 }
  0x38   :  { %340 = vmatprep.subr.mxu0 %v70_v16  ;;  %372 = vmatpush3.msra.mxu1 %v172_v19 }
  0x39   :  { %341 = vmatpush3.msra.mxu0 %v70_v16  ;;  %373 = vmatprep.subr.mxu1 %v171_v21 }
  0x3a   :  { %342 = vmatprep.subr.mxu0 %v69_v18  ;;  %374 = vmatpush3.msra.mxu1 %v171_v21 }
  0x3b   :  { %343 = vmatpush3.msra.mxu0 %v69_v18  ;;  %375 = vmatprep.subr.mxu1 %v170_v23 }
  0x3c   :  { %344 = vmatprep.subr.mxu0 %v68_v20  ;;  %376 = vmatpush3.msra.mxu1 %v170_v23 }
  0x3d   :  { %345 = vmatpush3.msra.mxu0 %v68_v20  ;;  %377 = vmatprep.subr.mxu1 %v169_v25 }
  0x3e   :  { %346 = vmatprep.subr.mxu0 %v67_v22  ;;  %378 = vmatpush3.msra.mxu1 %v169_v25 }
  0x3f   :  { %347 = vmatpush3.msra.mxu0 %v67_v22  ;;  %379 = vmatprep.subr.mxu1 %v168_v27 }
  0x40   :  { %348 = vmatprep.subr.mxu0 %v66_v24  ;;  %380 = vmatpush3.msra.mxu1 %v168_v27 }
  0x41   :  { %349 = vmatpush3.msra.mxu0 %v66_v24  ;;  %381 = vmatprep.subr.mxu1 %v167_v30 }
  0x42   :  { %350 = vmatprep.subr.mxu0 %v65_v26  ;;  %382 = vmatpush3.msra.mxu1 %v167_v30 }
  0x43   :  { %351 = vmatpush3.msra.mxu0 %v65_v26  ;;  %383 = vmatprep.subr.mxu1 %v166_v31 }
  0x44   :  { %352 = vmatprep.subr.mxu0 %v64_v28  ;;  %384 = vmatpush3.msra.mxu1 %v166_v31 }
  0x45   :  { %353 = vmatpush3.msra.mxu0 %v64_v28  ;;  %385 = vmatprep.subr.mxu1 %v165_v32 }
  0x46   :  { %355 = vmatmul.mubr.f32.vlgmr.msra.gmra.mxu0 %v63_v29  ;;  %386 = vmatpush3.msra.mxu1 %v165_v32 }
  0x47   :  { %387 = vmatprep.subr.mxu1 %v164_v33 }
  0x48   :  { %388 = vmatpush3.msra.mxu1 %v164_v33 }
 0x106   :  { %v356_v35 = vpop.f32.mrf.mxu0 }
 0x107   :  { %v159_v36 = vadd.f32 %v356_v35, %v284_v34 }
 0x108   :  { %v153_v37 = vpop.f32.mrf.mxu0 }
 0x109   :  { %v154_v38 = vadd.f32 %v284_v34, %v153_v37  ;;  %v163_v40 = vmax.f32 %v159_v36, 0.0 }
 0x10b   :  { %v162_v39 = vmax.f32 %v154_v38, 0.0 }
 0x10d   :  { %389 = vmatprep.mubr.f32.mxu1 %v162_v39 }
 0x10e   :  { %390 = vmatmul.mubr.f32.vlgmr.msra.gmra.mxu1 %v163_v40 }
 0x1ce   :  { %v391_v42 = vpop.f32.mrf.mxu1 }
 0x1cf   :  { %v259_v43 = vadd.f32 %v391_v42, %v285_v41 }
 0x1d0   :  { %v253_v44 = vpop.f32.mrf.mxu1 }
 0x1d1   :  { %v263_v45 = vadd.f32 %v259_v43, %v63_v29  ;;  %v254_v46 = vadd.f32 %v285_v41, %v253_v44 }
 0x1d3   :  { %265 = vst [vmem:[#allocation8 + $0x8] sm:$0xff] %v263_v45  ;;  %v262_v47 = vadd.f32 %v254_v46, %v538_v4 }
 0x1d5   :  { %264 = vst [vmem:[#allocation8] sm:$0xff] %v262_v47 }
 0x1d6   :  { %469 = shalt.err (!%p466_p5)
}
 0x1d7   :  { %277 = dma.vmem_to_hbm [thread:$0]  %s272_s12, 256, %s559_s5, [#allocation4], %s486_s23, %s486_s23, %s487_s24  }
 0x1d8   :  { %482 = dma.done.wait [#allocation4], 256  }
 0x1d9   :  { %483 = vsyncadd [#allocation4], 4294967040 }
 0x1da   :  { %281 = vsyncpa [#allocation3], 1 }
 0x1db   :  { %282 = vsyncpa [#allocation6], 1 }
 0x1dc   :  { %283 = vsyncpa [#allocation4], 1 }

</bundles_post_ra>
